<compile_context>
chip_gen: v6e
topology: v6e:2x2x1
jax: 0.10.0
libtpu: 0.0.40
codegen_flags: <defaults>
</compile_context>

<pallas_src>
import jax
import jax.numpy as jnp
from jax.experimental import pallas as pl
from jax.experimental.pallas import tpu as pltpu


def _round_up(x, m):
    return ((x + m - 1) // m) * m


def _make_kernel(n_valid, n_padded):
    """Build the fused kernel; n_valid/n_padded are static (closure)."""
    mask_needed = n_padded != n_valid

    def kernel(z_ref, w1_ref, b1_ref, w2_ref, out_ref):
        TB, Np, D = z_ref.shape
        F = w1_ref.shape[1]

        # Linear(D -> F) + ReLU on the MXU: fold (TB, Np) rows into one matmul
        # M dim. z/w1 are bf16, accumulation is f32. Reshape is layout-free
        # because Np is a multiple of 8 (wrapper guarantees it).
        z2 = z_ref[...].reshape(TB * Np, D)                       # (TB*Np, D) bf16
        h = jnp.dot(z2, w1_ref[...], preferred_element_type=jnp.float32)
        h = jnp.maximum(h + b1_ref[...], 0.0)                     # (TB*Np, F) f32

        # Linear(F -> 1) as a lane-axis multiply + reduce (VPU/XLU), not a
        # width-1 MXU matmul -> result stays lane-major (TB, Np). b2 is dropped
        # (softmax shift invariance).
        s = jnp.sum(h.reshape(TB, Np, F) * w2_ref[...], axis=-1)  # (TB, Np) f32

        if mask_needed:
            # Kill padded token lanes before the softmax.
            lane = jax.lax.broadcasted_iota(jnp.int32, (TB, Np), 1)
            s = jnp.where(lane < n_valid, s, jnp.float32(-1e30))

        # Softmax over the token axis (lanes), fully lane-dense, f32.
        m = jnp.max(s, axis=-1, keepdims=True)                    # (TB, 1)
        e = jnp.exp(s - m)                                        # (TB, Np)
        denom = jnp.sum(e, axis=-1, keepdims=True)                # (TB, 1)
        # Exact division (not pl.reciprocal(approx=True)): kernel is HBM-bound,
        # and downstream / tests assume exact row normalization.
        out_ref[...] = (e / denom).astype(out_ref.dtype)

    return kernel


def _choose_batch_tile(B, Np, D, F, in_itemsize,
                       vmem_budget_bytes=20 << 20, target_rows=4096):
    """Batch rows per grid step.

    Budgets the double-buffered z block, the f32 activation intermediate h
    (TB*Np*F*4 — the tensor that actually constrains v7x's 64 MiB VMEM for
    small D/F), and the double-buffered output block. Returns either the full
    (to-be-padded) batch or a multiple of 8 (sublane rule on the (TB, Np)
    output block), keeping >= 2 grid blocks when B >= 16 so both v7x
    TensorCores get work.
    """
    bytes_per_row = 2 * Np * D * in_itemsize + Np * F * 4 + 2 * Np * 4
    max_tb = max(1, vmem_budget_bytes // bytes_per_row)
    want_tb = max(1, -(-target_rows // Np))                 # ceil(target/Np)
    tb = min(B, max_tb, want_tb)

    if tb >= B:
        if B < 16:
            return B                                        # single full block
        # Split into (at least) 2 blocks for the 2 v7x TensorCores.
        tb = _round_up(-(-B // 2), 8)
        return min(tb, B)

    # Budget/target limited: round to a multiple of 8 (wrapper pads B up).
    if tb >= 8:
        tb = (tb // 8) * 8
    else:
        tb = 8                                              # tiny overshoot OK
    return tb


def acquisition_head(z, w1, b1, w2, *, compute_dtype=jnp.bfloat16,
                     vmem_data_budget=20 << 20, target_rows=4096):
    """z: [B, N, D]; w1: [D, F]; b1: [1, F]; w2: [F, 1] -> probs [B, N] (f32)."""
    B, N, D = z.shape
    F = w1.shape[1]
    in_itemsize = jnp.dtype(compute_dtype).itemsize

    # Sublane-align N so in-kernel reshapes are layout-free; pad B to a
    # multiple of the batch tile. Padded lanes are masked in-kernel, padded
    # batch rows are sliced off below.
    Np = _round_up(N, 8)
    TB = _choose_batch_tile(B, Np, D, F, in_itemsize,
                            vmem_data_budget, target_rows)
    Bp = _round_up(B, TB)
    grid = Bp // TB

    if Bp != B or Np != N:
        z = jnp.pad(z, ((0, Bp - B), (0, Np - N), (0, 0)))

    z_c = z.astype(compute_dtype)                 # dominant HBM stream -> bf16
    w1_c = w1.astype(compute_dtype)
    b1_f = b1.reshape(1, F).astype(jnp.float32)   # tiny, keep f32
    w2_row = w2.reshape(1, F).astype(jnp.float32) # lane-major weight row

    # Scoped VMEM: 2x z block + h + 2x out block + weights, with headroom;
    # capped at 48 MiB so it stays inside v7x's 64 MiB physical VMEM and still
    # raises v5e's 16 MiB default scoped limit.
    need = TB * (2 * Np * D * in_itemsize + Np * F * 4 + 2 * Np * 4) \
        + 4 * D * F * in_itemsize
    vmem_limit = int(min(max(2 * need, 16 << 20), 48 << 20))

    # TODO(synk): on v7x, fp8 z/w1 would halve the dominant HBM stream again;
    #             kept bf16 here pending an accuracy budget.
    out = pl.pallas_call(
        _make_kernel(N, Np),
        out_shape=jax.ShapeDtypeStruct((Bp, Np), jnp.float32),
        grid_spec=pltpu.PrefetchScalarGridSpec(
            num_scalar_prefetch=0,
            grid=(grid,),
            in_specs=[
                pl.BlockSpec((TB, Np, D), lambda b: (b, 0, 0)),
                pl.BlockSpec((D, F), lambda b: (0, 0)),
                pl.BlockSpec((1, F), lambda b: (0, 0)),
                pl.BlockSpec((1, F), lambda b: (0, 0)),
            ],
            out_specs=pl.BlockSpec((TB, Np), lambda b: (b, 0)),
        ),
        compiler_params=pltpu.CompilerParams(
            dimension_semantics=("parallel",),
            vmem_limit_bytes=vmem_limit,
        ),
    )(z_c, w1_c, b1_f, w2_row)

    if Bp != B or Np != N:
        out = out[:B, :N]
    return out


def reference_head(z, w1, b1, w2, b2):
    h = jnp.maximum(jnp.einsum("bnd,df->bnf", z, w1) + b1[0], 0.0)
    s = jnp.einsum("bnf,fo->bno", h, w2)[..., 0] + b2[0, 0]
    return jax.nn.softmax(s, axis=-1)


if __name__ == "__main__":
    # Module config (synthetic, deterministic init — no checkpoint loading).
    dim_embedding = 31
    time_token = True
    dim_in = dim_embedding + (1 if time_token else 0)        # 32
    dim_feedforward = 64

    B, N = 2, 8

    key = jax.random.PRNGKey(0)
    kz, kw1, kb1, kw2, kb2 = jax.random.split(key, 5)

    # Input embedding features [B, N, dim_in] (time token already concatenated).
    z = jax.random.normal(kz, (B, N, dim_in), dtype=jnp.float32)

    # Parameters. PyTorch Linear stores W as (out, in); we store the transpose
    # (in, out) so the kernel does z @ W directly.
    w1 = 0.1 * jax.random.normal(kw1, (dim_in, dim_feedforward), dtype=jnp.float32)
    b1 = 0.1 * jax.random.normal(kb1, (1, dim_feedforward), dtype=jnp.float32)
    w2 = 0.1 * jax.random.normal(kw2, (dim_feedforward, 1), dtype=jnp.float32)
    b2 = 0.1 * jax.random.normal(kb2, (1, 1), dtype=jnp.float32)  # ref only

    out = jax.block_until_ready(acquisition_head(z, w1, b1, w2))
    assert out.shape == (B, N), out.shape

    # Reference with bf16-rounded matmul inputs (matches MXU bf16xbf16->f32).
    z_r = z.astype(jnp.bfloat16).astype(jnp.float32)
    w1_r = w1.astype(jnp.bfloat16).astype(jnp.float32)
    ref = reference_head(z_r, w1_r, b1, w2, b2)
    assert jnp.allclose(out, ref, atol=2e-3, rtol=2e-3), (out, ref)
    # Sanity against the pure-f32 reference (bf16 input rounding only).
    ref32 = reference_head(z, w1, b1, w2, b2)
    assert jnp.allclose(out, ref32, atol=2e-2, rtol=2e-2)
    # Exact normalization (exact division in the kernel).
    assert jnp.allclose(jnp.sum(out, axis=-1), jnp.ones((B,)), atol=1e-5)

    # Second config exercising the tiling / padding / masking paths
    # (B not a tile multiple, N not a multiple of 8, grid >= 2).
    B2, N2 = 20, 12
    z2 = jax.random.normal(jax.random.PRNGKey(1), (B2, N2, dim_in), dtype=jnp.float32)
    out2 = jax.block_until_ready(acquisition_head(z2, w1, b1, w2))
    ref2 = reference_head(z2.astype(jnp.bfloat16).astype(jnp.float32),
                          w1_r, b1, w2, b2)
    assert out2.shape == (B2, N2), out2.shape
    assert jnp.allclose(out2, ref2, atol=2e-3, rtol=2e-3)
    assert jnp.allclose(jnp.sum(out2, axis=-1), jnp.ones((B2,)), atol=1e-5)

    print("KERNEL_OK")
</pallas_src>

<mosaic_0001>
module attributes {stable_mosaic.version = 11 : i64} {
  func.func @kernel(%arg0: i32, %arg1: memref<2x8x32xbf16, #tpu.memory_space<vmem>>, %arg2: memref<32x64xbf16, #tpu.memory_space<vmem>>, %arg3: memref<1x64xf32, #tpu.memory_space<vmem>>, %arg4: memref<1x64xf32, #tpu.memory_space<vmem>>, %arg5: memref<2x8xf32, #tpu.memory_space<vmem>>) attributes {dimension_semantics = [#tpu.dimension_semantics<parallel>], iteration_bounds = array<i64: 1>, scalar_prefetch = 0 : i64, scratch_operands = 0 : i64, tpu.core_type = #tpu.core_type<tc>, window_params = [{transform_indices = @transform_0, window_bounds = array<i64: 2, 8, 32>}, {pipeline_mode = #tpu.pipeline_mode<synchronous>, transform_indices = @transform_1, window_bounds = array<i64: 32, 64>}, {pipeline_mode = #tpu.pipeline_mode<synchronous>, transform_indices = @transform_2, window_bounds = array<i64: 1, 64>}, {pipeline_mode = #tpu.pipeline_mode<synchronous>, transform_indices = @transform_3, window_bounds = array<i64: 1, 64>}, {transform_indices = @transform_4, window_bounds = array<i64: 2, 8>}]} {
    %c0 = arith.constant 0 : index
    %c0_0 = arith.constant 0 : index
    %c0_1 = arith.constant 0 : index
    %0 = vector.load %arg1[%c0, %c0_0, %c0_1] : memref<2x8x32xbf16, #tpu.memory_space<vmem>>, vector<2x8x32xbf16>
    %1 = vector.shape_cast %0 : vector<2x8x32xbf16> to vector<16x32xbf16>
    %c0_2 = arith.constant 0 : index
    %c0_3 = arith.constant 0 : index
    %2 = vector.load %arg2[%c0_2, %c0_3] : memref<32x64xbf16, #tpu.memory_space<vmem>>, vector<32x64xbf16>
    %cst = arith.constant dense<0.000000e+00> : vector<16x64xf32>
    %3 = tpu.matmul %1, %2, %cst {dimension_numbers = #tpu.dot_dimension_numbers<[1], [0], [0], [1], [0, 0, 1, 1], [], []>} : vector<16x32xbf16>, vector<32x64xbf16>, vector<16x64xf32> -> vector<16x64xf32>
    %c0_4 = arith.constant 0 : index
    %c0_5 = arith.constant 0 : index
    %4 = vector.load %arg3[%c0_4, %c0_5] : memref<1x64xf32, #tpu.memory_space<vmem>>, vector<1x64xf32>
    %5 = vector.broadcast %4 : vector<1x64xf32> to vector<16x64xf32>
    %6 = arith.addf %3, %5 : vector<16x64xf32>
    %cst_6 = arith.constant 0.000000e+00 : f32
    %7 = vector.broadcast %cst_6 : f32 to vector<16x64xf32>
    %8 = arith.maximumf %6, %7 : vector<16x64xf32>
    %9 = vector.shape_cast %8 : vector<16x64xf32> to vector<2x8x64xf32>
    %c0_7 = arith.constant 0 : index
    %c0_8 = arith.constant 0 : index
    %10 = vector.load %arg4[%c0_7, %c0_8] : memref<1x64xf32, #tpu.memory_space<vmem>>, vector<1x64xf32>
    %11 = vector.shape_cast %10 : vector<1x64xf32> to vector<1x1x64xf32>
    %12 = vector.broadcast %11 : vector<1x1x64xf32> to vector<2x8x64xf32>
    %13 = arith.mulf %9, %12 : vector<2x8x64xf32>
    %cst_9 = arith.constant dense<0.000000e+00> : vector<2x8xf32>
    %14 = vector.multi_reduction <add>, %13, %cst_9 [2] : vector<2x8x64xf32> to vector<2x8xf32>
    %cst_10 = arith.constant dense<0xFF800000> : vector<2xf32>
    %15 = vector.multi_reduction <maximumf>, %14, %cst_10 [1] : vector<2x8xf32> to vector<2xf32>
    %16 = vector.shape_cast %15 : vector<2xf32> to vector<2x1xf32>
    %17 = vector.broadcast %16 : vector<2x1xf32> to vector<2x8xf32>
    %18 = arith.subf %14, %17 : vector<2x8xf32>
    %19 = math.exp %18 : vector<2x8xf32>
    %cst_11 = arith.constant dense<0.000000e+00> : vector<2xf32>
    %20 = vector.multi_reduction <add>, %19, %cst_11 [1] : vector<2x8xf32> to vector<2xf32>
    %21 = vector.shape_cast %20 : vector<2xf32> to vector<2x1xf32>
    %22 = vector.broadcast %21 : vector<2x1xf32> to vector<2x8xf32>
    %23 = arith.divf %19, %22 : vector<2x8xf32>
    %c0_12 = arith.constant 0 : index
    %c0_13 = arith.constant 0 : index
    %24 = vector.load %arg5[%c0_12, %c0_13] : memref<2x8xf32, #tpu.memory_space<vmem>>, vector<2x8xf32>
    tpu.vector_store %arg5[%c0_12, %c0_13], %23 {strides = array<i32>} : memref<2x8xf32, #tpu.memory_space<vmem>>, vector<2x8xf32>,
    return
  }
  func.func @transform_0(%arg0: i32) -> (i32, i32, i32) {
    %c0_i32 = arith.constant 0 : i32
    %c0_i32_0 = arith.constant 0 : i32
    %c0_i32_1 = arith.constant 0 : i32
    return %arg0, %c0_i32, %c0_i32_0 : i32, i32, i32
  }
  func.func @transform_1(%arg0: i32) -> (i32, i32) {
    %c0_i32 = arith.constant 0 : i32
    %c0_i32_0 = arith.constant 0 : i32
    %c0_i32_1 = arith.constant 0 : i32
    return %c0_i32, %c0_i32_0 : i32, i32
  }
  func.func @transform_2(%arg0: i32) -> (i32, i32) {
    %c0_i32 = arith.constant 0 : i32
    %c0_i32_0 = arith.constant 0 : i32
    %c0_i32_1 = arith.constant 0 : i32
    return %c0_i32, %c0_i32_0 : i32, i32
  }
  func.func @transform_3(%arg0: i32) -> (i32, i32) {
    %c0_i32 = arith.constant 0 : i32
    %c0_i32_0 = arith.constant 0 : i32
    %c0_i32_1 = arith.constant 0 : i32
    return %c0_i32, %c0_i32_0 : i32, i32
  }
  func.func @transform_4(%arg0: i32) -> (i32, i32) {
    %c0_i32 = arith.constant 0 : i32
    %c0_i32_0 = arith.constant 0 : i32
    return %arg0, %c0_i32 : i32, i32
  }
}

</mosaic_0001>

<bundles_post_ra>
// kernel: tpu_custom_call.1
= control target key start
LH: loop header
LB: loop body
LE: loop exit
PB: predicated region body
PF: predicated region fallthrough
CT: control target
= control target key end

     0   :  { %9 = vsyncpa [#allocation3], 0  ;;  %s405_s0 = inlined_call_operand.hbm [shape: bf16[2,8,32], index: 0, kind: input, shape index: {}]   ;;  %s406_s1 = inlined_call_operand.hbm [shape: bf16[32,64], index: 1, kind: input, shape index: {}]   ;;  %s407_s2 = inlined_call_operand.vmem [shape: f32[1,64], index: 2, kind: input, shape index: {}]   ;;  %s408_s3 = inlined_call_operand.vmem [shape: f32[1,64], index: 3, kind: input, shape index: {}]   ;;  %s409_s4 = inlined_call_operand.hbm [shape: f32[2,8], index: 4, kind: output, shape index: {}]  }
   0x1   :  { %10 = vsyncpa [#allocation6], 0 }
   0x2   :  { %11 = vsyncpa [#allocation4], 0  ;;  %s351_s15 = smov [#allocation2]  }
   0x3   :  { %s17_s16 = sshll.u32 %s351_s15, 4  ;;  %s18_s16 = int_to_ptr.vmem [resolvable:$true] %s17_s16 }
   0x4   :  { %s293_s17 = scalar_lea.vmem %s18_s16, 128  ;;  %p298_p1 = scmp.lt.s32.totalorder %s18_s16, %s18_s16 }
   0x5   :  { %p294_p0 = scmp.ne.s32.totalorder %s18_s16, %s293_s17  ;;  %p299_p2 = scmp.lt.s32.totalorder %s293_s17, %s293_s17 }
   0x7   :  { %p300_p3 = por %p299_p2, %p298_p1 }
   0x9   :  { %p301_p4 = pnand %p300_p3, %p294_p0 }
   0xb   :  { %304 = shalt.err (!%p301_p4)
}
   0xc   :  { %s352_s18 = smov 64   ;;  %s353_s19 = smov 4  }
   0xd   :  { %23 = dma.hbm_to_vmem [thread:$0]  %s405_s0, 128, %s18_s16, [#allocation3], %s352_s18, %s352_s18, %s353_s19  }
   0xe   :  { %s354_s22 = smov [#allocation5]  }
   0xf   :  { %s29_s23 = sshll.u32 %s354_s22, 4  ;;  %s30_s23 = int_to_ptr.vmem [resolvable:$true] %s29_s23 }
  0x10   :  { %s313_s24 = scalar_lea.vmem %s30_s23, 256  ;;  %p318_p6 = scmp.lt.s32.totalorder %s30_s23, %s30_s23 }
  0x11   :  { %p314_p5 = scmp.ne.s32.totalorder %s30_s23, %s313_s24  ;;  %p319_p7 = scmp.lt.s32.totalorder %s313_s24, %s313_s24 }
  0x13   :  { %p320_p8 = por %p319_p7, %p318_p6 }
  0x15   :  { %p321_p9 = pnand %p320_p8, %p314_p5 }
  0x17   :  { %324 = shalt.err (!%p321_p9)
}
  0x18   :  { %35 = dma.hbm_to_vmem [thread:$0]  %s406_s1, 256, %s30_s23, [#allocation6], %s352_s18, %s352_s18, %s353_s19  }
  0x19   :  { %345 = dma.done.wait [#allocation3], 128  }
  0x1a   :  { %346 = vsyncadd [#allocation3], 4294967168 }
  0x1b   :  { %347 = dma.done.wait [#allocation6], 256  }
  0x1c   :  { %348 = vsyncadd [#allocation6], 4294967040  ;;  %v355_v0 = vmov 0.0   ;;  %vm356_vm0 = vmmov 0   ;;  %v274_v1 = vld [vmem:[#allocation5 + $0x8] sm:$0xff]   ;;  %v275_v2 = vld [vmem:[#allocation5] sm:$0xff]   ;;  %v142_v18 = vlaneseq }
  0x1d   :  { %256 = vmatprep.subr.bf16.mxu0 %v355_v0  ;;  %260 = vmatprep.mubr.msk.bf16.mxu0 %vm356_vm0, %v355_v0  ;;  %v276_v3 = vld [vmem:[#allocation2] sm:$0xff]   ;;  %vm77_vm1 = vcmask 261120   ;;  %vm133_vm2 = vcmask 523264   ;;  %vm152_vm3 = vcmask 1041409   ;;  %vm155_vm4 = vcmask 58368  }
  0x1e   :  { %257 = vmatpush3.bf16.msra.mxu0 %v274_v1  ;;  %v247_v4 = vld [vmem:[%s407_s2] ss:$0 sm:$0xff]  ;;  %v143_v19 = vand.u32 127, %v142_v18  ;;  %v145_v20 = vshrl.u32 %v142_v18, 7  ;;  %v357_v28 = vmov 0   ;;  %s358_s2 = smov [#allocation7]  }
  0x1f   :  { %258 = vmatprep.subr.bf16.mxu0 %v355_v0  ;;  %v252_v8 = vld [vmem:[%s408_s3] ss:$0 sm:$0xff]  ;;  %273 = vset.pattern.permute.xlu0 %v357_v28  ;;  %s237_s3 = sshll.u32 %s358_s2, 4  ;;  %s238_s3 = int_to_ptr.vmem [resolvable:$true] %s237_s3 }
  0x20   :  { %v146_v22 = vsub.s32 %v143_v19, %v145_v20  ;;  %272 = vset.pattern.permute.xlu1 %v357_v28  ;;  %v162_v29 = vsub.s32 0, %v145_v20  ;;  %v166_v30 = vsub.s32 1, %v145_v20  ;;  %s325_s29 = scalar_lea.vmem %s238_s3, 32  ;;  %p330_p11 = scmp.lt.s32.totalorder %s238_s3, %s238_s3 }
  0x21   :  { %p326_p10 = scmp.ne.s32.totalorder %s238_s3, %s325_s29  ;;  %p331_p12 = scmp.lt.s32.totalorder %s325_s29, %s325_s29 }
  0x22   :  { %259 = vmatpush3.bf16.msra.mxu0 %v275_v2 }
  0x23   :  { %p332_p13 = por %p331_p12, %p330_p11 }
  0x25   :  { %261 = vmatmul.mubr.msk.bf16.vlgmr.msra.gmra.mxu0 %vm77_vm1, %v276_v3  ;;  %p333_p0 = pnand %p332_p13, %p326_p10 }
  0xe5   :  { %v115_v5 = vpop.f32.mrf.mxu0 }
  0xe6   :  { %v116_v6 = vadd.f32 %v247_v4, %v115_v5 }
  0xe7   :  { %v262_v7 = vpop.f32.mrf.mxu0 }
  0xe8   :  { %v122_v9 = vmax.f32 %v116_v6, 0.0 }
  0xe9   :  { %v118_v10 = vpop.f32.mrf.mxu0 }
  0xea   :  { %v119_v11 = vadd.f32 %v247_v4, %v118_v10  ;;  %v131_v12 = vmul.f32 %v252_v8, %v122_v9 }
  0xeb   :  { %v263_v13 = vpop.f32.mrf.mxu0 }
  0xec   :  { %v123_v14 = vmax.f32 %v119_v11, 0.0  ;;  %v134_v15 = vsel %vm133_vm2, %v131_v12, 0.0 }
  0xed   :  { %135 = vadd.xlane.f32.xlu0 %v134_v15 }
  0xee   :  { %v132_v16 = vmul.f32 %v252_v8, %v123_v14 }
  0xf0   :  { %v137_v17 = vsel %vm133_vm2, %v132_v16, 0.0 }
  0xf1   :  { %138 = vadd.xlane.f32.xlu0 %v137_v17 }
 0x176   :  { %v136_v21 = vpop.xlane.xlu0 %135 }
 0x177   :  { %v147_v24 = vrot.slane %v136_v21, %v146_v22 }
 0x17a   :  { %v139_v23 = vpop.xlane.xlu0 %138 }
 0x17b   :  { %v151_v25 = vrot.slane %v139_v23, %v146_v22 }
 0x17d   :  { %v153_v26 = vsel %vm152_vm3, %v151_v25, %v147_v24 }
 0x17e   :  { %v156_v27 = vsel %vm155_vm4, %v153_v26, -inf }
 0x17f   :  { %157 = vmax.xlane.f32.xlu1 %v156_v27 }
 0x208   :  { %v158_v31 = vpop.xlane.xlu1 %157 }
 0x209   :  { %v163_v32 = vrot.slane %v158_v31, %v162_v29  ;;  %v167_v33 = vrot.slane %v158_v31, %v166_v30 }
 0x20b   :  { %v170_v34 = vsub.f32 %v136_v21, %v163_v32  ;;  %v171_v35 = vsub.f32 %v139_v23, %v167_v33 }
 0x20d   :  { %v172_v36 = vmul.f32 1.442695, %v170_v34  ;;  %v174_v37 = vmul.f32 1.442695, %v171_v35 }
 0x20f   :  { %277 = vpow2.f32 %v172_v36 }
 0x210   :  { %279 = vpow2.f32 %v174_v37 }
 0x21c   :  { %v278_v38 = vpop.eup %277 }
 0x21d   :  { %v280_v39 = vpop.eup %279  ;;  %179 = vperm.xlu1 %272, %v278_v38  }
 0x21e   :  { %182 = vperm.xlu0 %273, %v280_v39  }
 0x298   :  { %v180_v40 = vpop.permute.xlu1 %179 }
 0x299   :  { %v183_v41 = vpop.permute.xlu0 %182  ;;  %v187_v42 = vrot.slane %v180_v40, %v146_v22 }
 0x29a   :  { %v191_v43 = vrot.slane %v183_v41, %v146_v22 }
 0x29c   :  { %v192_v44 = vsel %vm152_vm3, %v191_v43, %v187_v42 }
 0x29d   :  { %v194_v45 = vsel %vm155_vm4, %v192_v44, 0.0 }
 0x29e   :  { %195 = vadd.xlane.f32.xlu1 %v194_v45 }
 0x327   :  { %v196_v46 = vpop.xlane.xlu1 %195 }
 0x328   :  { %v201_v47 = vrot.slane %v196_v46, %v162_v29  ;;  %v205_v48 = vrot.slane %v196_v46, %v166_v30 }
 0x32a   :  { %281 = vrcp.f32 %v201_v47 }
 0x32b   :  { %283 = vrcp.f32 %v205_v48 }
 0x337   :  { %v282_v49 = vpop.eup %281 }
 0x338   :  { %v209_v50 = vmul.f32 %v282_v49, %v278_v38  ;;  %v284_v51 = vpop.eup %283 }
 0x339   :  { %v211_v52 = vmul.f32 %v284_v51, %v280_v39 }
 0x33a   :  { %215 = vperm.xlu0 %273, %v209_v50  }
 0x33e   :  { %218 = vperm.xlu0 %273, %v211_v52  }
 0x3b5   :  { %v216_v53 = vpop.permute.xlu0 %215 }
 0x3b6   :  { %v223_v55 = vrot.slane %v216_v53, %v146_v22 }
 0x3b9   :  { %v219_v54 = vpop.permute.xlu0 %218 }
 0x3ba   :  { %v227_v56 = vrot.slane %v219_v54, %v146_v22 }
 0x3bc   :  { %v228_v57 = vsel %vm152_vm3, %v227_v56, %v223_v55 }
 0x3bd   :  { %230 = vst.msk [vmem:[#allocation7] sm:$0x3] %vm155_vm4, %v228_v57 }
 0x3be   :  { %336 = shalt.err (!%p333_p0)
}
 0x3bf   :  { %240 = dma.vmem_to_hbm [thread:$0]  %s238_s3, 32, %s409_s4, [#allocation4]  }
 0x3c0   :  { %349 = dma.done.wait [#allocation4], 32  }
 0x3c1   :  { %350 = vsyncadd [#allocation4], 4294967264 }
 0x3c2   :  { %244 = vsyncpa [#allocation3], 1 }
 0x3c3   :  { %245 = vsyncpa [#allocation6], 1 }
 0x3c4   :  { %246 = vsyncpa [#allocation4], 1 }

</bundles_post_ra>
